<compile_context>
chip_gen: v6e
topology: v6e:2x2x1
jax: 0.10.0
libtpu: 0.0.40
codegen_flags: <defaults>
</compile_context>

<pallas_src>
import jax
import jax.numpy as jnp
from jax import lax
from jax.experimental import pallas as pl
from jax.experimental.pallas import tpu as pltpu


def _bilstm_recurrence_kernel(pre_ref,    # (TC, B, 8H) f32  pre-gates, bwd cols pre-reversed in time
                              w_rec_ref,  # (2H, 8H)    bf16 block-diag(fwd, bwd), gate-grouped
                              out_ref,    # (TC, B, 2H) f32  [h_fwd(t) | h_bwd(T-1-t)]
                              h_ref,      # (B, 2H)     f32  carry scratch (persists across grid)
                              c_ref):     # (B, 2H)     f32  carry scratch (persists across grid)
    TC, B, G = pre_ref.shape
    H2 = G // 4   # 2H

    @pl.when(pl.program_id(0) == 0)
    def _():
        h_ref[...] = jnp.zeros_like(h_ref)
        c_ref[...] = jnp.zeros_like(c_ref)

    w_rec = w_rec_ref[...]

    def step(t, carry):
        h_cat, c_cat = carry                      # [fwd H | bwd H], f32
        # Fused recurrent matmul: both directions' gates in one 8H-wide result.
        rec = jnp.dot(h_cat.astype(w_rec.dtype), w_rec,
                      preferred_element_type=jnp.float32)          # (B, 8H)
        gates = rec + pre_ref[t]                                   # (B, 8H)

        # Gate groups [i | f | o | g]: one wide sigmoid + one tanh.
        sig = jax.nn.sigmoid(gates[:, :3 * H2])                    # (B, 6H)
        g_g = jnp.tanh(gates[:, 3 * H2:])                          # (B, 2H)
        i_g = sig[:, 0 * H2:1 * H2]
        f_g = sig[:, 1 * H2:2 * H2]
        o_g = sig[:, 2 * H2:3 * H2]

        c_new = f_g * c_cat + i_g * g_g
        h_new = o_g * jnp.tanh(c_new)

        out_ref[t] = h_new                        # one full-row store per step
        return (h_new, c_new)

    h_fin, c_fin = lax.fori_loop(0, TC, step, (h_ref[...], c_ref[...]),
                                 unroll=True)
    h_ref[...] = h_fin
    c_ref[...] = c_fin


def _fuse_weights(params, E, H):
    """Gate-grouped fused weights: columns = [i_f i_b | f_f f_b | o_f o_b | g_f g_b]."""
    H2, G = 2 * H, 8 * H
    perm = jnp.array([0, 1, 3, 2])                 # PyTorch [i,f,g,o] -> [i,f,o,g]

    wihT_f = params["w_ih_f"].T.reshape(E, 4, H)[:, perm]          # (E, gate, H)
    wihT_b = params["w_ih_b"].T.reshape(E, 4, H)[:, perm]
    w_in = jnp.stack([wihT_f, wihT_b], axis=2).reshape(E, G)       # (E, 8H)

    whhT_f = params["w_hh_f"].T.reshape(H, 4, H)[:, perm]
    whhT_b = params["w_hh_b"].T.reshape(H, 4, H)[:, perm]
    w_rec = jnp.zeros((H2, 4, 2, H), jnp.float32)
    w_rec = w_rec.at[:H, :, 0, :].set(whhT_f)       # h_fwd -> fwd gate columns
    w_rec = w_rec.at[H:, :, 1, :].set(whhT_b)       # h_bwd -> bwd gate columns
    w_rec = w_rec.reshape(H2, G)

    b_f = (params["b_ih_f"] + params["b_hh_f"]).reshape(4, H)[perm]
    b_b = (params["b_ih_b"] + params["b_hh_b"]).reshape(4, H)[perm]
    b = jnp.stack([b_f, b_b], axis=1).reshape(G).astype(jnp.float32)
    return w_in, w_rec, b


def bilstm_forward(x, params, *, t_chunk=8):
    """x: (B, T, E) float32, batch_first like PyTorch. Returns (B, T, E) float32."""
    B, T, E = x.shape
    H = E // 2
    H2, G = 2 * H, 8 * H

    t_chunk = min(t_chunk, T)
    assert T % t_chunk == 0, "T must be divisible by t_chunk"
    n_chunks = T // t_chunk
    B_pad = max(8, ((B + 7) // 8) * 8)             # sublane-multiple batch

    w_in, w_rec, b = _fuse_weights(params, E, H)

    # ---- Hoisted input projection + bias (also fuses batch-first transpose) ----
    pre = jnp.einsum("bte,eg->tbg", x, w_in) + b                    # (T, B, 8H) f32
    # Time-reverse the backward-direction columns ONCE, outside the serial loop.
    fwd_col = (jnp.arange(G) % H2) < H
    pre = jnp.where(fwd_col, pre, pre[::-1])
    if B_pad != B:
        pre = jnp.pad(pre, ((0, 0), (0, B_pad - B), (0, 0)))

    w_rec_bf16 = w_rec.astype(jnp.bfloat16)                         # MXU operand dtype

    # ---- Explicit VMEM budget (double-buffered pre/out chunks + weights + carries) ----
    pre_chunk_bytes = 4 * t_chunk * B_pad * G
    out_chunk_bytes = 4 * t_chunk * B_pad * H2
    need = 2 * (pre_chunk_bytes + out_chunk_bytes) + 2 * H2 * G + 2 * 4 * B_pad * H2
    vmem_limit = int(min(max(2 * need, 4 << 20), 48 << 20))

    h_all = pl.pallas_call(
        _bilstm_recurrence_kernel,
        out_shape=jax.ShapeDtypeStruct((T, B_pad, H2), jnp.float32),
        grid_spec=pltpu.PrefetchScalarGridSpec(
            num_scalar_prefetch=0,
            grid=(n_chunks,),
            in_specs=[
                pl.BlockSpec((t_chunk, B_pad, G), lambda c: (c, 0, 0)),
                pl.BlockSpec((H2, G), lambda c: (0, 0)),
            ],
            out_specs=pl.BlockSpec((t_chunk, B_pad, H2), lambda c: (c, 0, 0)),
            scratch_shapes=[
                pltpu.VMEM((B_pad, H2), jnp.float32),   # h carry
                pltpu.VMEM((B_pad, H2), jnp.float32),   # c carry
            ],
        ),
        compiler_params=pltpu.CompilerParams(
            dimension_semantics=("arbitrary",),
            vmem_limit_bytes=vmem_limit,
        ),
    )(pre, w_rec_bf16)

    # h_all[t] = [h_fwd(t) | h_bwd(T-1-t)] -> undo backward reversal, drop batch
    # padding, and go back to batch_first.  All bulk XLA epilogue ops.
    out_f = h_all[:, :B, :H]
    out_b = h_all[::-1, :B, H:]
    out_tm = jnp.concatenate([out_f, out_b], axis=-1)               # (T, B, E)
    return jnp.transpose(out_tm, (1, 0, 2))                         # (B, T, E)


# ----------------------------- pure-JAX reference ---------------------------
def _lstm_dir_ref(x, w_ih, w_hh, b_ih, b_hh, reverse):
    B, T, E = x.shape
    H = w_hh.shape[1]

    def cell(carry, x_t):
        h, c = carry
        gates = x_t @ w_ih.T + h @ w_hh.T + b_ih + b_hh
        i, f, g, o = jnp.split(gates, 4, axis=-1)
        i, f, o = jax.nn.sigmoid(i), jax.nn.sigmoid(f), jax.nn.sigmoid(o)
        g = jnp.tanh(g)
        c = f * c + i * g
        h = o * jnp.tanh(c)
        return (h, c), h

    xs = jnp.transpose(x, (1, 0, 2))
    if reverse:
        xs = xs[::-1]
    init = (jnp.zeros((B, H), jnp.float32), jnp.zeros((B, H), jnp.float32))
    _, hs = lax.scan(cell, init, xs)
    if reverse:
        hs = hs[::-1]
    return jnp.transpose(hs, (1, 0, 2))


def bilstm_reference(x, p):
    out_f = _lstm_dir_ref(x, p["w_ih_f"], p["w_hh_f"], p["b_ih_f"], p["b_hh_f"], False)
    out_b = _lstm_dir_ref(x, p["w_ih_b"], p["w_hh_b"], p["b_ih_b"], p["b_hh_b"], True)
    return jnp.concatenate([out_f, out_b], axis=-1)


# ---------------------------------- main -------------------------------------
if __name__ == "__main__":
    B, T, E = 2, 8, 32          # batch, seq, embed_dim
    H = E // 2                  # hidden_size per direction

    key = jax.random.PRNGKey(0)
    keys = jax.random.split(key, 9)
    bound = 1.0 / jnp.sqrt(H)   # PyTorch nn.LSTM init: U(-1/sqrt(H), 1/sqrt(H))

    def u(k, shape):
        return jax.random.uniform(k, shape, jnp.float32, -bound, bound)

    params = {
        "w_ih_f": u(keys[0], (4 * H, E)),
        "w_hh_f": u(keys[1], (4 * H, H)),
        "b_ih_f": u(keys[2], (4 * H,)),
        "b_hh_f": u(keys[3], (4 * H,)),
        "w_ih_b": u(keys[4], (4 * H, E)),
        "w_hh_b": u(keys[5], (4 * H, H)),
        "b_ih_b": u(keys[6], (4 * H,)),
        "b_hh_b": u(keys[7], (4 * H,)),
    }

    x = jax.random.normal(keys[8], (B, T, E), jnp.float32)

    # t_chunk=4 -> grid of 2 chunks, exercising the h/c carry across grid steps.
    fwd = jax.jit(lambda xx, pp: bilstm_forward(xx, pp, t_chunk=4))
    out = jax.block_until_ready(fwd(x, params))
    ref = jax.block_until_ready(bilstm_reference(x, params))

    assert out.shape == (B, T, E), out.shape
    # Recurrent matmul operands are bf16 -> loosened tolerance vs pure-f32 ref.
    assert jnp.allclose(out, ref, atol=3e-2, rtol=3e-2), float(jnp.max(jnp.abs(out - ref)))

    print("KERNEL_OK")
</pallas_src>

<mosaic_0001>
module attributes {stable_mosaic.version = 11 : i64} {
  func.func @_bilstm_recurrence_kernel(%arg0: i32, %arg1: memref<4x8x128xf32, #tpu.memory_space<vmem>>, %arg2: memref<32x128xbf16, #tpu.memory_space<vmem>>, %arg3: memref<4x8x32xf32, #tpu.memory_space<vmem>>, %arg4: memref<8x32xf32, #tpu.memory_space<vmem>>, %arg5: memref<8x32xf32, #tpu.memory_space<vmem>>) attributes {dimension_semantics = [#tpu.dimension_semantics<arbitrary>], iteration_bounds = array<i64: 2>, scalar_prefetch = 0 : i64, scratch_operands = 2 : i64, tpu.core_type = #tpu.core_type<tc>, window_params = [{transform_indices = @transform_0, window_bounds = array<i64: 4, 8, 128>}, {pipeline_mode = #tpu.pipeline_mode<synchronous>, transform_indices = @transform_1, window_bounds = array<i64: 32, 128>}, {transform_indices = @transform_2, window_bounds = array<i64: 4, 8, 32>}]} {
    %c0_i32 = arith.constant 0 : i32
    %0 = arith.cmpi eq, %arg0, %c0_i32 : i32
    %1 = arith.extui %0 : i1 to i32
    %c0_i32_0 = arith.constant 0 : i32
    %2 = arith.cmpi ne, %1, %c0_i32_0 : i32
    scf.if %2 {
      %cst_34 = arith.constant 0.000000e+00 : f32
      %112 = vector.broadcast %cst_34 : f32 to vector<8x32xf32>
      %c0_35 = arith.constant 0 : index
      %c0_36 = arith.constant 0 : index
      %113 = vector.load %arg4[%c0_35, %c0_36] : memref<8x32xf32, #tpu.memory_space<vmem>>, vector<8x32xf32>
      tpu.vector_store %arg4[%c0_35, %c0_36], %112 {strides = array<i32>} : memref<8x32xf32, #tpu.memory_space<vmem>>, vector<8x32xf32>,
      %cst_37 = arith.constant 0.000000e+00 : f32
      %114 = vector.broadcast %cst_37 : f32 to vector<8x32xf32>
      %c0_38 = arith.constant 0 : index
      %c0_39 = arith.constant 0 : index
      %115 = vector.load %arg5[%c0_38, %c0_39] : memref<8x32xf32, #tpu.memory_space<vmem>>, vector<8x32xf32>
      tpu.vector_store %arg5[%c0_38, %c0_39], %114 {strides = array<i32>} : memref<8x32xf32, #tpu.memory_space<vmem>>, vector<8x32xf32>,
    } else {
    }
    %c0 = arith.constant 0 : index
    %c0_1 = arith.constant 0 : index
    %3 = vector.load %arg2[%c0, %c0_1] : memref<32x128xbf16, #tpu.memory_space<vmem>>, vector<32x128xbf16>
    %c0_2 = arith.constant 0 : index
    %c0_3 = arith.constant 0 : index
    %4 = vector.load %arg4[%c0_2, %c0_3] : memref<8x32xf32, #tpu.memory_space<vmem>>, vector<8x32xf32>
    %c0_4 = arith.constant 0 : index
    %c0_5 = arith.constant 0 : index
    %5 = vector.load %arg5[%c0_4, %c0_5] : memref<8x32xf32, #tpu.memory_space<vmem>>, vector<8x32xf32>
    %c0_i32_6 = arith.constant 0 : i32
    %6 = arith.truncf %4 : vector<8x32xf32> to vector<8x32xbf16>
    %cst = arith.constant dense<0.000000e+00> : vector<8x128xf32>
    %7 = tpu.matmul %6, %3, %cst {dimension_numbers = #tpu.dot_dimension_numbers<[1], [0], [0], [1], [0, 0, 1, 1], [], []>} : vector<8x32xbf16>, vector<32x128xbf16>, vector<8x128xf32> -> vector<8x128xf32>
    %8 = arith.index_cast %c0_i32_6 : i32 to index
    %c0_7 = arith.constant 0 : index
    %c0_8 = arith.constant 0 : index
    %9 = vector.load %arg1[%8, %c0_7, %c0_8] : memref<4x8x128xf32, #tpu.memory_space<vmem>>, vector<1x8x128xf32>
    %10 = vector.shape_cast %9 : vector<1x8x128xf32> to vector<8x128xf32>
    %11 = arith.addf %7, %10 : vector<8x128xf32>
    %12 = vector.extract_strided_slice %11 {offsets = [0, 0], sizes = [8, 96], strides = [1, 1]} : vector<8x128xf32> to vector<8x96xf32>
    %13 = arith.negf %12 : vector<8x96xf32>
    %14 = math.exp %13 : vector<8x96xf32>
    %cst_9 = arith.constant 1.000000e+00 : f32
    %15 = vector.broadcast %cst_9 : f32 to vector<8x96xf32>
    %16 = arith.addf %15, %14 : vector<8x96xf32>
    %17 = arith.divf %15, %16 : vector<8x96xf32>
    %18 = vector.extract_strided_slice %11 {offsets = [0, 96], sizes = [8, 32], strides = [1, 1]} : vector<8x128xf32> to vector<8x32xf32>
    %19 = math.tanh %18 : vector<8x32xf32>
    %20 = vector.extract_strided_slice %17 {offsets = [0, 0], sizes = [8, 32], strides = [1, 1]} : vector<8x96xf32> to vector<8x32xf32>
    %21 = vector.extract_strided_slice %17 {offsets = [0, 32], sizes = [8, 32], strides = [1, 1]} : vector<8x96xf32> to vector<8x32xf32>
    %22 = vector.extract_strided_slice %17 {offsets = [0, 64], sizes = [8, 32], strides = [1, 1]} : vector<8x96xf32> to vector<8x32xf32>
    %23 = arith.mulf %21, %5 : vector<8x32xf32>
    %24 = arith.mulf %20, %19 : vector<8x32xf32>
    %25 = arith.addf %23, %24 : vector<8x32xf32>
    %26 = math.tanh %25 : vector<8x32xf32>
    %27 = arith.mulf %22, %26 : vector<8x32xf32>
    %28 = arith.index_cast %c0_i32_6 : i32 to index
    %c0_10 = arith.constant 0 : index
    %c0_11 = arith.constant 0 : index
    %29 = vector.load %arg3[%28, %c0_10, %c0_11] : memref<4x8x32xf32, #tpu.memory_space<vmem>>, vector<1x8x32xf32>
    %30 = vector.shape_cast %29 : vector<1x8x32xf32> to vector<8x32xf32>
    %31 = vector.shape_cast %27 : vector<8x32xf32> to vector<1x8x32xf32>
    tpu.vector_store %arg3[%28, %c0_10, %c0_11], %31 {strides = array<i32>} : memref<4x8x32xf32, #tpu.memory_space<vmem>>, vector<1x8x32xf32>,
    %c1_i32 = arith.constant 1 : i32
    %32 = arith.truncf %27 : vector<8x32xf32> to vector<8x32xbf16>
    %cst_12 = arith.constant dense<0.000000e+00> : vector<8x128xf32>
    %33 = tpu.matmul %32, %3, %cst_12 {dimension_numbers = #tpu.dot_dimension_numbers<[1], [0], [0], [1], [0, 0, 1, 1], [], []>} : vector<8x32xbf16>, vector<32x128xbf16>, vector<8x128xf32> -> vector<8x128xf32>
    %34 = arith.index_cast %c1_i32 : i32 to index
    %c0_13 = arith.constant 0 : index
    %c0_14 = arith.constant 0 : index
    %35 = vector.load %arg1[%34, %c0_13, %c0_14] : memref<4x8x128xf32, #tpu.memory_space<vmem>>, vector<1x8x128xf32>
    %36 = vector.shape_cast %35 : vector<1x8x128xf32> to vector<8x128xf32>
    %37 = arith.addf %33, %36 : vector<8x128xf32>
    %38 = vector.extract_strided_slice %37 {offsets = [0, 0], sizes = [8, 96], strides = [1, 1]} : vector<8x128xf32> to vector<8x96xf32>
    %39 = arith.negf %38 : vector<8x96xf32>
    %40 = math.exp %39 : vector<8x96xf32>
    %cst_15 = arith.constant 1.000000e+00 : f32
    %41 = vector.broadcast %cst_15 : f32 to vector<8x96xf32>
    %42 = arith.addf %41, %40 : vector<8x96xf32>
    %43 = arith.divf %41, %42 : vector<8x96xf32>
    %44 = vector.extract_strided_slice %37 {offsets = [0, 96], sizes = [8, 32], strides = [1, 1]} : vector<8x128xf32> to vector<8x32xf32>
    %45 = math.tanh %44 : vector<8x32xf32>
    %46 = vector.extract_strided_slice %43 {offsets = [0, 0], sizes = [8, 32], strides = [1, 1]} : vector<8x96xf32> to vector<8x32xf32>
    %47 = vector.extract_strided_slice %43 {offsets = [0, 32], sizes = [8, 32], strides = [1, 1]} : vector<8x96xf32> to vector<8x32xf32>
    %48 = vector.extract_strided_slice %43 {offsets = [0, 64], sizes = [8, 32], strides = [1, 1]} : vector<8x96xf32> to vector<8x32xf32>
    %49 = arith.mulf %47, %25 : vector<8x32xf32>
    %50 = arith.mulf %46, %45 : vector<8x32xf32>
    %51 = arith.addf %49, %50 : vector<8x32xf32>
    %52 = math.tanh %51 : vector<8x32xf32>
    %53 = arith.mulf %48, %52 : vector<8x32xf32>
    %54 = arith.index_cast %c1_i32 : i32 to index
    %c0_16 = arith.constant 0 : index
    %c0_17 = arith.constant 0 : index
    %55 = vector.load %arg3[%54, %c0_16, %c0_17] : memref<4x8x32xf32, #tpu.memory_space<vmem>>, vector<1x8x32xf32>
    %56 = vector.shape_cast %55 : vector<1x8x32xf32> to vector<8x32xf32>
    %57 = vector.shape_cast %53 : vector<8x32xf32> to vector<1x8x32xf32>
    tpu.vector_store %arg3[%54, %c0_16, %c0_17], %57 {strides = array<i32>} : memref<4x8x32xf32, #tpu.memory_space<vmem>>, vector<1x8x32xf32>,
    %c2_i32 = arith.constant 2 : i32
    %58 = arith.truncf %53 : vector<8x32xf32> to vector<8x32xbf16>
    %cst_18 = arith.constant dense<0.000000e+00> : vector<8x128xf32>
    %59 = tpu.matmul %58, %3, %cst_18 {dimension_numbers = #tpu.dot_dimension_numbers<[1], [0], [0], [1], [0, 0, 1, 1], [], []>} : vector<8x32xbf16>, vector<32x128xbf16>, vector<8x128xf32> -> vector<8x128xf32>
    %60 = arith.index_cast %c2_i32 : i32 to index
    %c0_19 = arith.constant 0 : index
    %c0_20 = arith.constant 0 : index
    %61 = vector.load %arg1[%60, %c0_19, %c0_20] : memref<4x8x128xf32, #tpu.memory_space<vmem>>, vector<1x8x128xf32>
    %62 = vector.shape_cast %61 : vector<1x8x128xf32> to vector<8x128xf32>
    %63 = arith.addf %59, %62 : vector<8x128xf32>
    %64 = vector.extract_strided_slice %63 {offsets = [0, 0], sizes = [8, 96], strides = [1, 1]} : vector<8x128xf32> to vector<8x96xf32>
    %65 = arith.negf %64 : vector<8x96xf32>
    %66 = math.exp %65 : vector<8x96xf32>
    %cst_21 = arith.constant 1.000000e+00 : f32
    %67 = vector.broadcast %cst_21 : f32 to vector<8x96xf32>
    %68 = arith.addf %67, %66 : vector<8x96xf32>
    %69 = arith.divf %67, %68 : vector<8x96xf32>
    %70 = vector.extract_strided_slice %63 {offsets = [0, 96], sizes = [8, 32], strides = [1, 1]} : vector<8x128xf32> to vector<8x32xf32>
    %71 = math.tanh %70 : vector<8x32xf32>
    %72 = vector.extract_strided_slice %69 {offsets = [0, 0], sizes = [8, 32], strides = [1, 1]} : vector<8x96xf32> to vector<8x32xf32>
    %73 = vector.extract_strided_slice %69 {offsets = [0, 32], sizes = [8, 32], strides = [1, 1]} : vector<8x96xf32> to vector<8x32xf32>
    %74 = vector.extract_strided_slice %69 {offsets = [0, 64], sizes = [8, 32], strides = [1, 1]} : vector<8x96xf32> to vector<8x32xf32>
    %75 = arith.mulf %73, %51 : vector<8x32xf32>
    %76 = arith.mulf %72, %71 : vector<8x32xf32>
    %77 = arith.addf %75, %76 : vector<8x32xf32>
    %78 = math.tanh %77 : vector<8x32xf32>
    %79 = arith.mulf %74, %78 : vector<8x32xf32>
    %80 = arith.index_cast %c2_i32 : i32 to index
    %c0_22 = arith.constant 0 : index
    %c0_23 = arith.constant 0 : index
    %81 = vector.load %arg3[%80, %c0_22, %c0_23] : memref<4x8x32xf32, #tpu.memory_space<vmem>>, vector<1x8x32xf32>
    %82 = vector.shape_cast %81 : vector<1x8x32xf32> to vector<8x32xf32>
    %83 = vector.shape_cast %79 : vector<8x32xf32> to vector<1x8x32xf32>
    tpu.vector_store %arg3[%80, %c0_22, %c0_23], %83 {strides = array<i32>} : memref<4x8x32xf32, #tpu.memory_space<vmem>>, vector<1x8x32xf32>,
    %c3_i32 = arith.constant 3 : i32
    %84 = arith.truncf %79 : vector<8x32xf32> to vector<8x32xbf16>
    %cst_24 = arith.constant dense<0.000000e+00> : vector<8x128xf32>
    %85 = tpu.matmul %84, %3, %cst_24 {dimension_numbers = #tpu.dot_dimension_numbers<[1], [0], [0], [1], [0, 0, 1, 1], [], []>} : vector<8x32xbf16>, vector<32x128xbf16>, vector<8x128xf32> -> vector<8x128xf32>
    %86 = arith.index_cast %c3_i32 : i32 to index
    %c0_25 = arith.constant 0 : index
    %c0_26 = arith.constant 0 : index
    %87 = vector.load %arg1[%86, %c0_25, %c0_26] : memref<4x8x128xf32, #tpu.memory_space<vmem>>, vector<1x8x128xf32>
    %88 = vector.shape_cast %87 : vector<1x8x128xf32> to vector<8x128xf32>
    %89 = arith.addf %85, %88 : vector<8x128xf32>
    %90 = vector.extract_strided_slice %89 {offsets = [0, 0], sizes = [8, 96], strides = [1, 1]} : vector<8x128xf32> to vector<8x96xf32>
    %91 = arith.negf %90 : vector<8x96xf32>
    %92 = math.exp %91 : vector<8x96xf32>
    %cst_27 = arith.constant 1.000000e+00 : f32
    %93 = vector.broadcast %cst_27 : f32 to vector<8x96xf32>
    %94 = arith.addf %93, %92 : vector<8x96xf32>
    %95 = arith.divf %93, %94 : vector<8x96xf32>
    %96 = vector.extract_strided_slice %89 {offsets = [0, 96], sizes = [8, 32], strides = [1, 1]} : vector<8x128xf32> to vector<8x32xf32>
    %97 = math.tanh %96 : vector<8x32xf32>
    %98 = vector.extract_strided_slice %95 {offsets = [0, 0], sizes = [8, 32], strides = [1, 1]} : vector<8x96xf32> to vector<8x32xf32>
    %99 = vector.extract_strided_slice %95 {offsets = [0, 32], sizes = [8, 32], strides = [1, 1]} : vector<8x96xf32> to vector<8x32xf32>
    %100 = vector.extract_strided_slice %95 {offsets = [0, 64], sizes = [8, 32], strides = [1, 1]} : vector<8x96xf32> to vector<8x32xf32>
    %101 = arith.mulf %99, %77 : vector<8x32xf32>
    %102 = arith.mulf %98, %97 : vector<8x32xf32>
    %103 = arith.addf %101, %102 : vector<8x32xf32>
    %104 = math.tanh %103 : vector<8x32xf32>
    %105 = arith.mulf %100, %104 : vector<8x32xf32>
    %106 = arith.index_cast %c3_i32 : i32 to index
    %c0_28 = arith.constant 0 : index
    %c0_29 = arith.constant 0 : index
    %107 = vector.load %arg3[%106, %c0_28, %c0_29] : memref<4x8x32xf32, #tpu.memory_space<vmem>>, vector<1x8x32xf32>
    %108 = vector.shape_cast %107 : vector<1x8x32xf32> to vector<8x32xf32>
    %109 = vector.shape_cast %105 : vector<8x32xf32> to vector<1x8x32xf32>
    tpu.vector_store %arg3[%106, %c0_28, %c0_29], %109 {strides = array<i32>} : memref<4x8x32xf32, #tpu.memory_space<vmem>>, vector<1x8x32xf32>,
    %c4_i32 = arith.constant 4 : i32
    %c0_30 = arith.constant 0 : index
    %c0_31 = arith.constant 0 : index
    %110 = vector.load %arg4[%c0_30, %c0_31] : memref<8x32xf32, #tpu.memory_space<vmem>>, vector<8x32xf32>
    tpu.vector_store %arg4[%c0_30, %c0_31], %105 {strides = array<i32>} : memref<8x32xf32, #tpu.memory_space<vmem>>, vector<8x32xf32>,
    %c0_32 = arith.constant 0 : index
    %c0_33 = arith.constant 0 : index
    %111 = vector.load %arg5[%c0_32, %c0_33] : memref<8x32xf32, #tpu.memory_space<vmem>>, vector<8x32xf32>
    tpu.vector_store %arg5[%c0_32, %c0_33], %103 {strides = array<i32>} : memref<8x32xf32, #tpu.memory_space<vmem>>, vector<8x32xf32>,
    return
  }
  func.func @transform_0(%arg0: i32) -> (i32, i32, i32) {
    %c0_i32 = arith.constant 0 : i32
    %c0_i32_0 = arith.constant 0 : i32
    %c0_i32_1 = arith.constant 0 : i32
    return %arg0, %c0_i32, %c0_i32_0 : i32, i32, i32
  }
  func.func @transform_1(%arg0: i32) -> (i32, i32) {
    %c0_i32 = arith.constant 0 : i32
    %c0_i32_0 = arith.constant 0 : i32
    %c0_i32_1 = arith.constant 0 : i32
    return %c0_i32, %c0_i32_0 : i32, i32
  }
  func.func @transform_2(%arg0: i32) -> (i32, i32, i32) {
    %c0_i32 = arith.constant 0 : i32
    %c0_i32_0 = arith.constant 0 : i32
    %c0_i32_1 = arith.constant 0 : i32
    return %arg0, %c0_i32, %c0_i32_0 : i32, i32, i32
  }
}

</mosaic_0001>

<bundles_post_ra>
// kernel: _lambda_.1
= control target key start
LH: loop header
LB: loop body
LE: loop exit
PB: predicated region body
PF: predicated region fallthrough
CT: control target
= control target key end

     0   :  { %s700_s9 = smov 0   ;;  %s779_s0 = inlined_call_operand.vmem [shape: f32[8,8,128], index: 0, kind: input, shape index: {}]   ;;  %s780_s1 = inlined_call_operand.vmem [shape: bf16[32,128], index: 1, kind: input, shape index: {}]   ;;  %s781_s2 = inlined_call_operand.vmem [shape: f32[8,8,32], index: 2, kind: output, shape index: {}]  }
   0x1 LB: > { %s551_s10 = sadd.s32 4294967295, %s677_s9   ;;  %p555_p0 = scmp.ge.s32.totalorder %s677_s9, 1  ;;  %s677_s9 = sphi %s700_s9, %s12_s9  }
   0x2   : > { %p113_p1 = scmp.lt.s32.totalorder %s677_s9, 3 }
   0x4   : > { %p114_p2 = pnand %p555_p0, %p113_p1 }
   0x5   : > { %s556_s11 = sshll.u32 (!%p114_p2), %s551_s10, 2  ;;  %p560_p4 = scmp.ne.s32.totalorder (!%p114_p2), %s551_s10, 0 }
   0x6   : > { %117 = sbr.rel (%p114_p2) target bundleno = 2790 (0xae6), region = 28  ;;  %p136_p3 = scmp.lt.s32.totalorder (!%p114_p2), %s556_s11, 7 }
   0xb   : > { %s783_s11 = smov (!%p136_p3, %s556_s11), 7  ;;  %151 = sbr.rel (%p560_p4) target bundleno = 18 (0x12), region = 32 }
   0xc   : > { %s557_s12 = sshll.u32 %s783_s11, 3 }
   0xd   : > { %s711_s15 = scalar_lea.vmem %s779_s0, %s557_s12  ;;  %s716_s18 = scalar_lea.vmem %s781_s2, %s557_s12 }
  0x10   : > { %vm152_vm0 = vcmask 261120   ;;  %v679_v0 = vmov 0.0  }
  0x11   : > { %153 = vst.msk [vmem:[#allocation2] sm:$0xff] %vm152_vm0, %v679_v0  ;;  %154 = vst.msk [vmem:[#allocation3] sm:$0xff] %vm152_vm0, %v679_v0 }
  0x12 PF: > { %v637_v1 = vld [vmem:[%s780_s1 + $0x8] sm:$0xff]   ;;  %v680_v2 = vmov 0.0   ;;  %v638_v3 = vld [vmem:[%s780_s1] sm:$0xff]   ;;  %vm681_vm1 = vmmov 0   ;;  %vm175_vm2 = vcmask 261120   ;;  %s682_s23 = smov 32  }
  0x13   : > { %591 = vmatprep.subr.bf16.mxu0 %v680_v2  ;;  %599 = vmatprep.subr.bf16.mxu1 %v680_v2  ;;  %v162_v6 = vld [vmem:[%s711_s15] sm:$0xff]  ;;  %s683_s24 = smov 64   ;;  %v565_v29 = vld [vmem:[%s711_s15 + $0x8] sm:$0xff]  ;;  %v569_v50 = vld [vmem:[%s711_s15 + $0x10] sm:$0xff]  ;;  %s684_s25 = smov 96  }
  0x14   : > { %592 = vmatpush3.bf16.msra.mxu0 %v637_v1  ;;  %595 = vmatprep.mubr.msk.bf16.mxu0 %vm681_vm1, %v680_v2 }
  0x15   : > { %593 = vmatprep.subr.bf16.mxu0 %v680_v2  ;;  %600 = vmatpush3.bf16.msra.mxu1 %v637_v1 }
  0x16   : > { %601 = vmatprep.subr.bf16.mxu1 %v680_v2  ;;  %603 = vmatprep.mubr.msk.bf16.mxu1 %vm681_vm1, %v680_v2 }
  0x18   : > { %v159_v4 = vld [vmem:[#allocation2] sm:$0xff]  ;;  %594 = vmatpush3.bf16.msra.mxu0 %v638_v3  ;;  %v160_v13 = vld [vmem:[#allocation3] sm:$0xff] }
  0x19   : > { %v161_v5 = vpack.c.bf16 %v159_v4, %v159_v4  ;;  %602 = vmatpush3.bf16.msra.mxu1 %v638_v3  ;;  %607 = vmatprep.subr.bf16.mxu0 %v680_v2 }
  0x1a   : > { %615 = vmatprep.subr.bf16.mxu1 %v680_v2 }
  0x1b   : > { %596 = vmatmul.mubr.msk.bf16.vlgmr.msra.gmra.mxu0 %vm175_vm2, %v161_v5 }
  0x1c   : > { %608 = vmatpush3.bf16.msra.mxu0 %v637_v1  ;;  %611 = vmatprep.mubr.msk.bf16.mxu0 %vm681_vm1, %v680_v2 }
  0x1d   : > { %609 = vmatprep.subr.bf16.mxu0 %v680_v2 }
  0x20   : > { %610 = vmatpush3.bf16.msra.mxu0 %v638_v3 }
  0xdb   : > { %v213_v7 = vpop.f32.mrf.mxu0 }
  0xdc   : > { %v214_v8 = vadd.f32 %v213_v7, %v162_v6  ;;  %v573_v7 = vld [vmem:[%s711_s15 + $0x18] sm:$0xff] }
  0xdd   : > { %v597_v9 = vpop.f32.mrf.mxu0 }
  0xde   : > { %639 = vtanh.f32 %v214_v8  ;;  %v564_v14 = vmul.f32 -1.442695, %v214_v8 }
  0xdf   : > { %v216_v10 = vpop.f32.mrf.mxu0 }
  0xe0   : > { %641 = vpow2.f32 %v564_v14 }
  0xe1   : > { %v598_v11 = vpop.f32.mrf.mxu0 }
  0xeb   : > { %v640_v12 = vpop.eup %639 }
  0xec   : > { %232 = vrot.lane.b32.xlu0 %v640_v12, %s682_s23 }
  0xed   : > { %v642_v15 = vpop.eup %641 }
  0xee   : > { %v222_v16 = vadd.f32 1.0, %v642_v15 }
  0xf0   : > { %227 = vrot.lane.b32.xlu0 %v160_v13, %s682_s23  ;;  %643 = vrcp.f32 %v222_v16 }
  0xfd   : > { %v644_v17 = vpop.eup %643 }
 0x15e   : > { %v233_v18 = vpop.permute.xlu0 %232 }
 0x15f   : > { %v235_v19 = vmul.f32 %v644_v17, %v233_v18 }
 0x161   : > { %237 = vrot.lane.b32.xlu1 %v235_v19, %s682_s23 }
 0x162   : > { %v228_v20 = vpop.permute.xlu0 %227 }
 0x163   : > { %v230_v21 = vmul.f32 %v644_v17, %v228_v20 }
 0x1d3   : > { %v238_v22 = vpop.permute.xlu1 %237 }
 0x1d4   : > { %v240_v23 = vadd.f32 %v238_v22, %v230_v21 }
 0x1d6   : > { %645 = vtanh.f32 %v240_v23 }
 0x1e3   : > { %v646_v24 = vpop.eup %645 }
 0x1e4   : > { %243 = vrot.lane.b32.xlu1 %v646_v24, %s682_s23 }
 0x256   : > { %v244_v25 = vpop.permute.xlu1 %243 }
 0x257   : > { %v733_v26 = vmul.f32 %v644_v17, %v244_v25 }
 0x259   : > { %v252_v27 = vpack.c.bf16 %v733_v26, %v733_v26 }
 0x25b   : > { %256 = vrot.lane.b32.xlu0 %v252_v27, %s683_s24 }
 0x2cd   : > { %v257_v28 = vpop.permute.xlu0 %256 }
 0x2ce   : > { %604 = vmatmul.mubr.msk.bf16.vlgmr.msra.gmra.mxu1 %vm175_vm2, %v257_v28 }
 0x2cf   : > { %616 = vmatpush3.bf16.msra.mxu1 %v637_v1  ;;  %619 = vmatprep.mubr.msk.bf16.mxu1 %vm681_vm1, %v680_v2 }
 0x2d0   : > { %617 = vmatprep.subr.bf16.mxu1 %v680_v2 }
 0x2d3   : > { %618 = vmatpush3.bf16.msra.mxu1 %v638_v3 }
 0x38e   : > { %v295_v30 = vpop.f32.mrf.mxu1 }
 0x38f   : > { %v296_v31 = vadd.f32 %v565_v29, %v295_v30 }
 0x390   : > { %v605_v32 = vpop.f32.mrf.mxu1 }
 0x391   : > { %647 = vtanh.f32 %v296_v31  ;;  %v567_v36 = vmul.f32 -1.442695, %v296_v31 }
 0x392   : > { %v298_v33 = vpop.f32.mrf.mxu1 }
 0x393   : > { %649 = vpow2.f32 %v567_v36 }
 0x394   : > { %v606_v34 = vpop.f32.mrf.mxu1 }
 0x39e   : > { %v648_v35 = vpop.eup %647 }
 0x39f   : > { %310 = vrot.lane.b32.xlu1 %v648_v35, %s682_s23 }
 0x3a0   : > { %v650_v37 = vpop.eup %649 }
 0x3a1   : > { %v304_v38 = vadd.f32 1.0, %v650_v37 }
 0x3a3   : > { %651 = vrcp.f32 %v304_v38 }
 0x3b0   : > { %v652_v39 = vpop.eup %651 }
 0x3b1   : > { %v308_v42 = vmul.f32 %v652_v39, %v240_v23 }
 0x411   : > { %v311_v40 = vpop.permute.xlu1 %310 }
 0x412   : > { %v313_v41 = vmul.f32 %v652_v39, %v311_v40 }
 0x414   : > { %315 = vrot.lane.b32.xlu0 %v313_v41, %s682_s23 }
 0x486   : > { %v316_v43 = vpop.permute.xlu0 %315 }
 0x487   : > { %v318_v44 = vadd.f32 %v316_v43, %v308_v42 }
 0x489   : > { %653 = vtanh.f32 %v318_v44 }
 0x496   : > { %v654_v45 = vpop.eup %653 }
 0x497   : > { %321 = vrot.lane.b32.xlu1 %v654_v45, %s682_s23 }
 0x509   : > { %v322_v46 = vpop.permute.xlu1 %321 }
 0x50a   : > { %v744_v47 = vmul.f32 %v652_v39, %v322_v46 }
 0x50c   : > { %v331_v48 = vpack.c.bf16 %v744_v47, %v744_v47 }
 0x50e   : > { %335 = vrot.lane.b32.xlu0 %v331_v48, %s683_s24 }
 0x580   : > { %v336_v49 = vpop.permute.xlu0 %335 }
 0x581   : > { %612 = vmatmul.mubr.msk.bf16.vlgmr.msra.gmra.mxu0 %vm175_vm2, %v336_v49 }
 0x641   : > { %v374_v51 = vpop.f32.mrf.mxu0 }
 0x642   : > { %v375_v52 = vadd.f32 %v569_v50, %v374_v51 }
 0x643   : > { %v613_v53 = vpop.f32.mrf.mxu0 }
 0x644   : > { %655 = vtanh.f32 %v375_v52  ;;  %v571_v57 = vmul.f32 -1.442695, %v375_v52 }
 0x645   : > { %v377_v54 = vpop.f32.mrf.mxu0 }
 0x646   : > { %657 = vpow2.f32 %v571_v57 }
 0x647   : > { %v614_v55 = vpop.f32.mrf.mxu0 }
 0x651   : > { %v656_v56 = vpop.eup %655 }
 0x652   : > { %389 = vrot.lane.b32.xlu1 %v656_v56, %s682_s23 }
 0x653   : > { %v658_v58 = vpop.eup %657 }
 0x654   : > { %v383_v59 = vadd.f32 1.0, %v658_v58 }
 0x656   : > { %659 = vrcp.f32 %v383_v59 }
 0x663   : > { %v660_v60 = vpop.eup %659 }
 0x664   : > { %v387_v63 = vmul.f32 %v660_v60, %v318_v44 }
 0x6c4   : > { %v390_v61 = vpop.permute.xlu1 %389 }
 0x6c5   : > { %v392_v62 = vmul.f32 %v660_v60, %v390_v61 }
 0x6c7   : > { %394 = vrot.lane.b32.xlu0 %v392_v62, %s682_s23 }
 0x739   : > { %v395_v0 = vpop.permute.xlu0 %394 }
 0x73a   : > { %v397_v1 = vadd.f32 %v395_v0, %v387_v63 }
 0x73c   : > { %661 = vtanh.f32 %v397_v1 }
 0x749   : > { %v662_v2 = vpop.eup %661 }
 0x74a   : > { %400 = vrot.lane.b32.xlu1 %v662_v2, %s682_s23 }
 0x7bc   : > { %v401_v3 = vpop.permute.xlu1 %400 }
 0x7bd   : > { %v403_v4 = vmul.f32 %v660_v60, %v401_v3 }
 0x7bf   : > { %v410_v5 = vpack.c.bf16 %v403_v4, %v403_v4 }
 0x7c1   : > { %414 = vrot.lane.b32.xlu0 %v410_v5, %s683_s24 }
 0x833   : > { %v415_v6 = vpop.permute.xlu0 %414 }
 0x834   : > { %620 = vmatmul.mubr.msk.bf16.vlgmr.msra.gmra.mxu1 %vm175_vm2, %v415_v6 }
 0x8f4   : > { %v453_v8 = vpop.f32.mrf.mxu1 }
 0x8f5   : > { %v454_v9 = vadd.f32 %v573_v7, %v453_v8 }
 0x8f6   : > { %v621_v10 = vpop.f32.mrf.mxu1 }
 0x8f7   : > { %663 = vtanh.f32 %v454_v9  ;;  %v575_v14 = vmul.f32 -1.442695, %v454_v9 }
 0x8f8   : > { %v456_v11 = vpop.f32.mrf.mxu1 }
 0x8f9   : > { %665 = vpow2.f32 %v575_v14 }
 0x8fa   : > { %v622_v12 = vpop.f32.mrf.mxu1 }
 0x904   : > { %v664_v13 = vpop.eup %663 }
 0x905   : > { %468 = vrot.lane.b32.xlu1 %v664_v13, %s682_s23 }
 0x906   : > { %v666_v15 = vpop.eup %665 }
 0x907   : > { %v462_v16 = vadd.f32 1.0, %v666_v15 }
 0x909   : > { %667 = vrcp.f32 %v462_v16 }
 0x916   : > { %v668_v17 = vpop.eup %667 }
 0x917   : > { %v466_v20 = vmul.f32 %v668_v17, %v397_v1 }
 0x977   : > { %v469_v18 = vpop.permute.xlu1 %468 }
 0x978   : > { %v471_v19 = vmul.f32 %v668_v17, %v469_v18 }
 0x97a   : > { %473 = vrot.lane.b32.xlu0 %v471_v19, %s682_s23 }
 0x97e   : > { %248 = vrot.lane.b32.xlu0 %v733_v26, %s683_s24 }
 0x982   : > { %405 = vrot.lane.b32.xlu0 %v403_v4, %s683_s24 }
 0x9ec   : > { %v474_v21 = vpop.permute.xlu0 %473 }
 0x9ed   : > { %v476_v22 = vadd.f32 %v474_v21, %v466_v20 }
 0x9ef   : > { %669 = vtanh.f32 %v476_v22  ;;  %491 = vrot.lane.b32.xlu0 %v476_v22, %s684_s25 }
 0x9f0   : > { %v249_v23 = vpop.permute.xlu0 %248 }
 0x9f1   : > { %251 = vst.msk [vmem:[%s716_s18] sm:$0xff] %vm175_vm2, %v249_v23 }
 0x9f4   : > { %v406_v25 = vpop.permute.xlu0 %405 }
 0x9f5   : > { %572 = vst.msk [vmem:[%s716_s18 + $0x10] sm:$0xff] %vm175_vm2, %v406_v25 }
 0x9fc   : > { %v670_v24 = vpop.eup %669 }
 0x9fd   : > { %479 = vrot.lane.b32.xlu1 %v670_v24, %s682_s23 }
 0xa01   : > { %326 = vrot.lane.b32.xlu1 %v744_v47, %s683_s24 }
 0xa61   : > { %v492_v26 = vpop.permute.xlu0 %491 }
 0xa62   : > { %494 = vst.msk [vmem:[#allocation3] sm:$0xff] %vm175_vm2, %v492_v26 }
 0xa6f   : > { %v480_v27 = vpop.permute.xlu1 %479 }
 0xa70   : > { %v482_v28 = vmul.f32 %v668_v17, %v480_v27 }
 0xa72   : > { %484 = vrot.lane.b32.xlu1 %v482_v28, %s683_s24 }
 0xa73   : > { %v327_v29 = vpop.permute.xlu1 %326 }
 0xa74   : > { %568 = vst.msk [vmem:[%s716_s18 + $0x8] sm:$0xff] %vm175_vm2, %v327_v29 }
 0xae4   : > { %v485_v30 = vpop.permute.xlu1 %484 }
 0xae5   : > { %576 = vst.msk [vmem:[%s716_s18 + $0x18] sm:$0xff] %vm175_vm2, %v485_v30  ;;  %489 = vst.msk [vmem:[#allocation2] sm:$0xff] %vm175_vm2, %v485_v30 }
 0xae6 PF: > { %s12_s9 = sadd.s32 1, %s677_s9  }
 0xae7   : > { %p9_p5 = scmp.ge.s32.totalorder %s12_s9, 4  }
 0xae9   :  { %11 = sbr.rel (!%p9_p5) target bundleno = 1 (0x1), region = 68 }

</bundles_post_ra>
